<compile_context>
chip_gen: v5e
topology: v5e:2x2
jax: 0.10.0
libtpu: 0.0.40
codegen_flags: <defaults>
</compile_context>

<pallas_src>
import functools

import jax
import jax.numpy as jnp
from jax.experimental import pallas as pl
from jax.experimental.pallas import tpu as pltpu

# Keep the per-grid-step working set comfortably inside v7x's 64 MiB physical VMEM
# (default scoped limit is only 16/32 MiB).  Raise to ~96 MiB on v5e/v6e.
_VMEM_LIMIT_BYTES = 48 * 1024 * 1024

_HIGHEST = jax.lax.Precision.HIGHEST


def project_kernel(x_ref, w_ref, a1_ref, a2_ref, wh3_ref, f1_ref, f2t_ref,
                   *, nheads, fout):
    """One lane-dense projection matmul for all heads + hoisted logit projections.

    x_ref   : (tq, Fin)
    w_ref   : (Fin, H*Fout)   all heads packed along the lane axis
    a1_ref  : (H, Fout)       first half of each head's attention vector
    a2_ref  : (H, Fout)       second half of each head's attention vector
    wh3_ref : (H, tq, Fout)   per-head projected features (leading-axis head index)
    f1_ref  : (tq, H)         f1[n,h] = <Wh_h[n,:], a1_h>   (query-side logits)
    f2t_ref : (H, tq)         f2t[h,n] = <Wh_h[n,:], a2_h>  (key-side, pre-transposed)
    """
    tq = x_ref.shape[0]
    wh = jnp.dot(x_ref[...], w_ref[...],
                 preferred_element_type=jnp.float32,
                 precision=_HIGHEST)                          # (tq, H*Fout)
    wh3 = wh.reshape(tq, nheads, fout)                        # (tq, H, Fout)

    # Hoisted attention-logit projections: computed once here instead of being
    # recomputed for every query tile inside the attention kernel.
    f1 = jnp.sum(wh3 * a1_ref[...][None, :, :], axis=-1)      # (tq, H)
    f2 = jnp.sum(wh3 * a2_ref[...][None, :, :], axis=-1)      # (tq, H)

    wh3_ref[...] = jnp.transpose(wh3, (1, 0, 2))              # (H, tq, Fout)
    f1_ref[...] = f1
    f2t_ref[...] = f2.T                                       # (H, tq): row h is a
    #                                                           ready-made key row-vector.


def gat_attention_kernel(adj_ref, f1_ref, f2t_ref, wh3_ref, out_ref,
                         *, nheads, alpha):
    """All attention heads for one tile of query rows.

    adj_ref : (tq, N)       adjacency row slab (any dtype; only `> 0` is used)
    f1_ref  : (tq, H)       query-side logit projections (row tile)
    f2t_ref : (H, N)        key-side logit projections (grid-invariant)
    wh3_ref : (H, N, Fout)  per-head projected features (grid-invariant)
    out_ref : (tq, H*Fout)  concatenated elu(head) outputs — single full-width store
    """
    adj_mask = adj_ref[...] > 0                    # (tq, N) bool, shared by all heads
    f1 = f1_ref[...]                               # (tq, H)

    outs = []
    for h in range(nheads):                        # static unroll, H is small
        e = f1[:, h:h + 1] + f2t_ref[h:h + 1, :]   # (tq, N) broadcast add
        e = jnp.maximum(e, alpha * e)              # LeakyReLU (alpha in (0,1))
        e = jnp.where(adj_mask, e, -9e15)          # mask non-edges
        e = e - jnp.max(e, axis=1, keepdims=True)
        p = jnp.exp(e)
        att = p / jnp.sum(p, axis=1, keepdims=True)            # exact row softmax

        hp = jnp.dot(att, wh3_ref[h],
                     preferred_element_type=jnp.float32,
                     precision=_HIGHEST)                        # (tq, Fout)
        outs.append(jnp.where(hp > 0.0, hp, jnp.exp(hp) - 1.0))  # ELU (concat=True)

    out_ref[...] = jnp.concatenate(outs, axis=-1)  # one lane-dense (tq, H*Fout) store


def gat_layer(x, adj, w_all, a1, a2, *, alpha, block_q=256):
    """One multi-head GAT attention layer (all heads fused, concat output).

    x     : (N, Fin) float32
    adj   : (N, N)   any dtype (only `> 0` used; int8 recommended)
    w_all : (Fin, H*Fout)  heads packed along the lane axis
    a1,a2 : (H, Fout)
    returns (N, H*Fout) float32 (per-head elu applied, heads concatenated)
    """
    N, fin = x.shape
    H, fout = a1.shape
    hf = H * fout
    assert w_all.shape == (fin, hf)

    tq = N if N <= block_q else block_q
    assert N % tq == 0, "N must be divisible by the query-row tile"
    grid = (N // tq,)
    cparams = pltpu.CompilerParams(
        dimension_semantics=("parallel",),
        vmem_limit_bytes=_VMEM_LIMIT_BYTES)

    # 1) One pass over node rows: projection matmul + hoisted F1/F2 logit projections.
    wh3, f1, f2t = pl.pallas_call(
        functools.partial(project_kernel, nheads=H, fout=fout),
        out_shape=(jax.ShapeDtypeStruct((H, N, fout), jnp.float32),
                   jax.ShapeDtypeStruct((N, H), jnp.float32),
                   jax.ShapeDtypeStruct((H, N), jnp.float32)),
        grid=grid,
        in_specs=[
            pl.BlockSpec((tq, fin), lambda i: (i, 0)),     # x row tile
            pl.BlockSpec((fin, hf), lambda i: (0, 0)),     # packed W (shared)
            pl.BlockSpec((H, fout), lambda i: (0, 0)),     # a1 (shared)
            pl.BlockSpec((H, fout), lambda i: (0, 0)),     # a2 (shared)
        ],
        out_specs=(pl.BlockSpec((H, tq, fout), lambda i: (0, i, 0)),
                   pl.BlockSpec((tq, H), lambda i: (i, 0)),
                   pl.BlockSpec((H, tq), lambda i: (0, i))),
        compiler_params=cparams,
    )(x, w_all, a1, a2)

    # 2) Row-tiled attention; adjacency streamed in (tq, N) slabs, key-side tensors
    #    grid-invariant, output lane-dense.
    kernel = functools.partial(gat_attention_kernel, nheads=H, alpha=alpha)
    return pl.pallas_call(
        kernel,
        out_shape=jax.ShapeDtypeStruct((N, hf), jnp.float32),
        grid=grid,
        in_specs=[
            pl.BlockSpec((tq, N), lambda i: (i, 0)),       # adj row slab
            pl.BlockSpec((tq, H), lambda i: (i, 0)),       # f1 (query rows)
            pl.BlockSpec((H, N), lambda i: (0, 0)),        # f2^T (all keys, shared)
            pl.BlockSpec((H, N, fout), lambda i: (0, 0, 0)),  # Wh per head (shared)
        ],
        out_specs=pl.BlockSpec((tq, hf), lambda i: (i, 0)),
        compiler_params=cparams,
    )(adj, f1, f2t, wh3)


def spgat_forward(x, left, adj, params, *, alpha=0.2):
    """SpGAT.forward: dropout (identity in eval) + multi-head attention + concat."""
    del left  # present in the PyTorch signature but unused in forward
    # TODO(synk): F.dropout(x, p, training=True) is stochastic; identity in eval mode.
    return gat_layer(x, adj, params["W_heads"], params["a1_heads"],
                     params["a2_heads"], alpha=alpha)


def init_params(key, nhid, nheads):
    """Deterministic xavier-uniform-style init, packed into lane-dense layout."""
    nfeat = nhid // nheads            # SpGAT: nfeat = nhid / nheads
    ks = jax.random.split(key, 2)

    def xavier(k, shape):
        fan_in, fan_out = shape[-2], shape[-1]
        limit = (6.0 / (fan_in + fan_out)) ** 0.5
        return jax.random.uniform(k, shape, jnp.float32, -limit, limit)

    W = xavier(ks[0], (nheads, nfeat, nhid))        # per-head W: (H, Fin, Fout)
    a = xavier(ks[1], (nheads, 2 * nhid, 1))        # per-head a: (H, 2*Fout, 1)
    return {
        # Heads packed along the lane axis: column block h == head h's W.
        "W_heads": jnp.transpose(W, (1, 0, 2)).reshape(nfeat, nheads * nhid),
        "a1_heads": a[:, :nhid, 0],                 # (H, Fout)
        "a2_heads": a[:, nhid:, 0],                 # (H, Fout)
    }


def _reference_forward(x, adj, params, alpha=0.2):
    """Pure-JAX reference (same packed param layout, full-precision matmuls)."""
    w_all, a1, a2 = params["W_heads"], params["a1_heads"], params["a2_heads"]
    H, fout = a1.shape
    Wh = jnp.dot(x, w_all, precision=_HIGHEST)
    outs = []
    for h in range(H):
        Wh_h = Wh[:, h * fout:(h + 1) * fout]
        e = (jnp.dot(Wh_h, a1[h][:, None], precision=_HIGHEST)
             + jnp.dot(Wh_h, a2[h][:, None], precision=_HIGHEST).T)
        e = jnp.where(e > 0, e, alpha * e)
        att = jnp.where(adj > 0, e, -9e15)
        att = jax.nn.softmax(att, axis=1)
        hp = jnp.dot(att, Wh_h, precision=_HIGHEST)
        outs.append(jnp.where(hp > 0, hp, jnp.exp(hp) - 1.0))
    return jnp.concatenate(outs, axis=-1)


if __name__ == "__main__":
    nhid, nheads = 32, 4
    nfeat = nhid // nheads                      # SpGAT: input dim = nhid / nheads
    N = 16
    key = jax.random.PRNGKey(0)
    kx, kadj, kp = jax.random.split(key, 3)

    x = jax.random.normal(kx, (N, nfeat), dtype=jnp.float32)
    left = jnp.arange(N, dtype=jnp.int32)       # unused by forward, kept for parity
    adj_f = (jax.random.uniform(kadj, (N, N)) > 0.5).astype(jnp.float32)
    adj_f = adj_f + jnp.eye(N, dtype=jnp.float32)   # self loops -> no empty rows
    # Only `adj > 0` is tested in-kernel, so pass adjacency in int8 to shrink the
    # dominant N^2 HBM stream (values 0/1/2 are exact in int8).
    adj = adj_f.astype(jnp.int8)

    params = init_params(kp, nhid, nheads)

    out = spgat_forward(x, left, adj, params, alpha=0.2)
    out = jax.block_until_ready(out)

    ref = _reference_forward(x, adj, params, alpha=0.2)
    assert out.shape == (N, nheads * nhid)
    assert jnp.allclose(out, ref, atol=1e-3, rtol=1e-3), "mismatch vs JAX reference"

    print("KERNEL_OK")
</pallas_src>

<mosaic_0001>
module attributes {stable_mosaic.version = 11 : i64} {
  func.func @project_kernel(%arg0: i32, %arg1: memref<16x8xf32, #tpu.memory_space<vmem>>, %arg2: memref<8x128xf32, #tpu.memory_space<vmem>>, %arg3: memref<4x32xf32, #tpu.memory_space<vmem>>, %arg4: memref<4x32xf32, #tpu.memory_space<vmem>>, %arg5: memref<4x16x32xf32, #tpu.memory_space<vmem>>, %arg6: memref<16x4xf32, #tpu.memory_space<vmem>>, %arg7: memref<4x16xf32, #tpu.memory_space<vmem>>) attributes {dimension_semantics = [#tpu.dimension_semantics<parallel>], iteration_bounds = array<i64: 1>, scalar_prefetch = 0 : i64, scratch_operands = 0 : i64, tpu.core_type = #tpu.core_type<tc>, window_params = [{transform_indices = @transform_0, window_bounds = array<i64: 16, 8>}, {pipeline_mode = #tpu.pipeline_mode<synchronous>, transform_indices = @transform_1, window_bounds = array<i64: 8, 128>}, {pipeline_mode = #tpu.pipeline_mode<synchronous>, transform_indices = @transform_2, window_bounds = array<i64: 4, 32>}, {pipeline_mode = #tpu.pipeline_mode<synchronous>, transform_indices = @transform_3, window_bounds = array<i64: 4, 32>}, {transform_indices = @transform_4, window_bounds = array<i64: 4, 16, 32>}, {transform_indices = @transform_5, window_bounds = array<i64: 16, 4>}, {transform_indices = @transform_6, window_bounds = array<i64: 4, 16>}]} {
    %c0 = arith.constant 0 : index
    %c0_0 = arith.constant 0 : index
    %0 = vector.load %arg1[%c0, %c0_0] : memref<16x8xf32, #tpu.memory_space<vmem>>, vector<16x8xf32>
    %c0_1 = arith.constant 0 : index
    %c0_2 = arith.constant 0 : index
    %1 = vector.load %arg2[%c0_1, %c0_2] : memref<8x128xf32, #tpu.memory_space<vmem>>, vector<8x128xf32>
    %cst = arith.constant dense<0.000000e+00> : vector<16x128xf32>
    %2 = tpu.matmul %0, %1, %cst {dimension_numbers = #tpu.dot_dimension_numbers<[1], [0], [0], [1], [0, 0, 1, 1], [], []>, precision = #tpu.contract_precision<fp32>} : vector<16x8xf32>, vector<8x128xf32>, vector<16x128xf32> -> vector<16x128xf32>
    %3 = vector.shape_cast %2 : vector<16x128xf32> to vector<16x4x32xf32>
    %c0_3 = arith.constant 0 : index
    %c0_4 = arith.constant 0 : index
    %4 = vector.load %arg3[%c0_3, %c0_4] : memref<4x32xf32, #tpu.memory_space<vmem>>, vector<4x32xf32>
    %5 = vector.shape_cast %4 : vector<4x32xf32> to vector<1x4x32xf32>
    %6 = vector.broadcast %5 : vector<1x4x32xf32> to vector<16x4x32xf32>
    %7 = arith.mulf %3, %6 : vector<16x4x32xf32>
    %cst_5 = arith.constant dense<0.000000e+00> : vector<16x4xf32>
    %8 = vector.multi_reduction <add>, %7, %cst_5 [2] : vector<16x4x32xf32> to vector<16x4xf32>
    %c0_6 = arith.constant 0 : index
    %c0_7 = arith.constant 0 : index
    %9 = vector.load %arg4[%c0_6, %c0_7] : memref<4x32xf32, #tpu.memory_space<vmem>>, vector<4x32xf32>
    %10 = vector.shape_cast %9 : vector<4x32xf32> to vector<1x4x32xf32>
    %11 = vector.broadcast %10 : vector<1x4x32xf32> to vector<16x4x32xf32>
    %12 = arith.mulf %3, %11 : vector<16x4x32xf32>
    %cst_8 = arith.constant dense<0.000000e+00> : vector<16x4xf32>
    %13 = vector.multi_reduction <add>, %12, %cst_8 [2] : vector<16x4x32xf32> to vector<16x4xf32>
    %14 = tpu.transpose %3, [1, 0, 2] : vector<16x4x32xf32> -> vector<4x16x32xf32>
    %c0_9 = arith.constant 0 : index
    %c0_10 = arith.constant 0 : index
    %c0_11 = arith.constant 0 : index
    %15 = vector.load %arg5[%c0_9, %c0_10, %c0_11] : memref<4x16x32xf32, #tpu.memory_space<vmem>>, vector<4x16x32xf32>
    tpu.vector_store %arg5[%c0_9, %c0_10, %c0_11], %14 {strides = array<i32>} : memref<4x16x32xf32, #tpu.memory_space<vmem>>, vector<4x16x32xf32>,
    %c0_12 = arith.constant 0 : index
    %c0_13 = arith.constant 0 : index
    %16 = vector.load %arg6[%c0_12, %c0_13] : memref<16x4xf32, #tpu.memory_space<vmem>>, vector<16x4xf32>
    tpu.vector_store %arg6[%c0_12, %c0_13], %8 {strides = array<i32>} : memref<16x4xf32, #tpu.memory_space<vmem>>, vector<16x4xf32>,
    %17 = tpu.transpose %13, [1, 0] : vector<16x4xf32> -> vector<4x16xf32>
    %c0_14 = arith.constant 0 : index
    %c0_15 = arith.constant 0 : index
    %18 = vector.load %arg7[%c0_14, %c0_15] : memref<4x16xf32, #tpu.memory_space<vmem>>, vector<4x16xf32>
    tpu.vector_store %arg7[%c0_14, %c0_15], %17 {strides = array<i32>} : memref<4x16xf32, #tpu.memory_space<vmem>>, vector<4x16xf32>,
    return
  }
  func.func @transform_0(%arg0: i32) -> (i32, i32) {
    %c0_i32 = arith.constant 0 : i32
    %c0_i32_0 = arith.constant 0 : i32
    return %arg0, %c0_i32 : i32, i32
  }
  func.func @transform_1(%arg0: i32) -> (i32, i32) {
    %c0_i32 = arith.constant 0 : i32
    %c0_i32_0 = arith.constant 0 : i32
    %c0_i32_1 = arith.constant 0 : i32
    return %c0_i32, %c0_i32_0 : i32, i32
  }
  func.func @transform_2(%arg0: i32) -> (i32, i32) {
    %c0_i32 = arith.constant 0 : i32
    %c0_i32_0 = arith.constant 0 : i32
    %c0_i32_1 = arith.constant 0 : i32
    return %c0_i32, %c0_i32_0 : i32, i32
  }
  func.func @transform_3(%arg0: i32) -> (i32, i32) {
    %c0_i32 = arith.constant 0 : i32
    %c0_i32_0 = arith.constant 0 : i32
    %c0_i32_1 = arith.constant 0 : i32
    return %c0_i32, %c0_i32_0 : i32, i32
  }
  func.func @transform_4(%arg0: i32) -> (i32, i32, i32) {
    %c0_i32 = arith.constant 0 : i32
    %c0_i32_0 = arith.constant 0 : i32
    %c0_i32_1 = arith.constant 0 : i32
    return %c0_i32, %arg0, %c0_i32_0 : i32, i32, i32
  }
  func.func @transform_5(%arg0: i32) -> (i32, i32) {
    %c0_i32 = arith.constant 0 : i32
    %c0_i32_0 = arith.constant 0 : i32
    return %arg0, %c0_i32 : i32, i32
  }
  func.func @transform_6(%arg0: i32) -> (i32, i32) {
    %c0_i32 = arith.constant 0 : i32
    %c0_i32_0 = arith.constant 0 : i32
    return %c0_i32, %arg0 : i32, i32
  }
}

</mosaic_0001>

<bundles_post_ra>
// kernel: tpu_custom_call.1
= control target key start
LH: loop header
LB: loop body
LE: loop exit
PB: predicated region body
PF: predicated region fallthrough
CT: control target
= control target key end

     0   :  { %12 = vsyncpa [#allocation3], 0  ;;  %vm25_vm0 = vcmask 64512   ;;  %s1202_s0 = inlined_call_operand.vmem [shape: f32[16,8], index: 0, kind: input, shape index: {}]   ;;  %s1203_s1 = inlined_call_operand.vmem [shape: f32[8,128], index: 1, kind: input, shape index: {}]   ;;  %s1204_s2 = inlined_call_operand.vmem [shape: f32[4,32], index: 2, kind: input, shape index: {}]   ;;  %s1205_s3 = inlined_call_operand.vmem [shape: f32[4,32], index: 3, kind: input, shape index: {}]   ;;  %s1206_s4 = inlined_call_operand.hbm [shape: f32[4,16,32], index: 4, kind: output, shape index: {0}]   ;;  %s1207_s5 = inlined_call_operand.vmem [shape: f32[16,4], index: 5, kind: output, shape index: {1}]   ;;  %s1208_s6 = inlined_call_operand.hbm [shape: f32[4,16], index: 6, kind: output, shape index: {2}]  }
   0x1   :  { %v24_v0 = vld [vmem:[%s1203_s1] sm:$0xff]  ;;  %v23_v1 = vld [vmem:[%s1202_s0 + $0x8] sm:$0xff] }
   0x2   :  { %v22_v2 = vld [vmem:[%s1202_s0] sm:$0xff]  ;;  %v47_v3 = vand.u32 4294901760, %v24_v0  ;;  %v30_v4 = vsel %vm25_vm0, %v23_v1, 0 }
   0x3   :  { %v27_v5 = vsel %vm25_vm0, %v22_v2, 0 }
   0x4   :  { %13 = vsyncpa [#allocation5], 0  ;;  %v57_v6 = vand.u32 4294901760, %v30_v4  ;;  %v49_v7 = vand.u32 4294901760, %v27_v5  ;;  %770 = vmatpush.msra.mxu2 %v47_v3  ;;  %v82_v8 = vsub.f32 %v24_v0, %v47_v3  ;;  %48 = vmatpush.msra.mxu0 %v47_v3  ;;  %s834_s0 = smov 32   ;;  %s835_s1 = smov 64  }
   0x5   :  { %s836_s27 = smov 96   ;;  %v837_v42 = vmov 1983009808   ;;  %vm230_vm1 = vcmask 1047556   ;;  %v838_v49 = vmov 1934713408  }
   0x6   :  { %v58_v9 = vsub.f32 %v30_v4, %v57_v6  ;;  %v50_v10 = vsub.f32 %v27_v5, %v49_v7  ;;  %v83_v11 = vand.u32 4294901760, %v82_v8  ;;  %113 = vmatpush.msrb.mxu2 %v82_v8  ;;  %v235_v43 = vunpack.c.l.s4 %v837_v42  ;;  %v908_v5 = vld [vmem:[%s1204_s2] sm:$0xf]  ;;  %s738_s12 = sshll.u32 %s1206_s4, 4  ;;  %s839_s13 = smov [#allocation2]   ;;  %s739_s12 = int_to_ptr.hbm [resolvable:$true] %s738_s12 }
   0x7   :  { %v259_v50 = vunpack.c.l.s4 %v838_v49  ;;  %vm359_vm2 = vcmask 257024   ;;  %vm581_vm3 = vcmask 261120   ;;  %vm624_vm4 = vcmask 1041409   ;;  %s736_s14 = sshll.u32 %s839_s13, 4  ;;  %s840_s15 = smov 128   ;;  %s737_s14 = int_to_ptr.vmem [resolvable:$true] %s736_s14 }
   0x8   :  { %v59_v12 = vand.u32 4294901760, %v58_v9  ;;  %v51_v13 = vand.u32 4294901760, %v50_v10  ;;  %v84_v14 = vsub.f32 %v82_v8, %v83_v11  ;;  %173 = vmatpush.msrb.mxu0 %v83_v11  ;;  %v892_v45 = vunpack.c.0.s8 %v235_v43  ;;  %s841_s16 = smov 8   ;;  %s842_s17 = smov [#allocation4]  }
   0x9   :  { %v900_v61 = vunpack.c.0.s8 %v259_v50  ;;  %vm626_vm5 = vcmask 1042434   ;;  %vm628_vm6 = vcmask 1043459   ;;  %vm630_vm7 = vcmask 1044484   ;;  %s752_s18 = sshll.u32 %s842_s17, 4  ;;  %s753_s18 = int_to_ptr.vmem [resolvable:$true] %s752_s18 }
   0xa   :  { %v60_v15 = vsub.f32 %v58_v9, %v59_v12  ;;  %v52_v16 = vsub.f32 %v50_v10, %v51_v13  ;;  %v85_v17 = vand.u32 4294901760, %v84_v14  ;;  %vm632_vm8 = vcmask 1045509  }
   0xb   :  { %vm634_vm9 = vcmask 1046534   ;;  %vm636_vm10 = vcmask 1047559   ;;  %vm647_vm11 = vcmask 31744   ;;  %vm730_vm12 = vcmask 125952  }
   0xc   :  { %v61_v18 = vand.u32 4294901760, %v60_v15  ;;  %v53_v19 = vand.u32 4294901760, %v52_v16  ;;  %771 = vmatpush.msra.mxu3 %v85_v17  ;;  %86 = vmatpush.msra.mxu1 %v85_v17  ;;  %v922_v16 = vld [vmem:[%s1205_s3] sm:$0xf] }
   0xd   :  { %92 = vmatmul.f32.vlgmr.msra.gmra.mxu3 %v57_v6  ;;  %88 = vmatmul.f32.vlgmr.msra.gmra.mxu1 %v49_v7 }
   0xe   :  { %62 = vmatmul.f32.vlgmr.msra.gmra.mxu2 %v61_v18  ;;  %141 = vmatpush.msrb.mxu3 %v47_v3 }
   0xf   :  { %54 = vmatmul.f32.vlgmr.msra.gmra.mxu0 %v53_v19  ;;  %199 = vmatpush.msrb.mxu1 %v47_v3 }
  0x15   :  { %145 = vmatmul.f32.vlgmr.msrb.gmra.mxu3 %v51_v13  ;;  %201 = vmatmul.f32.vlgmr.msrb.gmra.mxu1 %v49_v7 }
  0x16   :  { %116 = vmatmul.f32.vlgmr.msrb.gmra.mxu2 %v50_v10 }
  0x17   :  { %175 = vmatmul.f32.vlgmr.msrb.gmra.mxu0 %v49_v7 }
  0x1d   :  { %151 = vmatmul.f32.gmra.mxu3 %v59_v12  ;;  %205 = vmatmul.f32.gmra.mxu1 %v57_v6 }
  0x1e   :  { %121 = vmatmul.f32.gmra.mxu2 %v58_v9 }
  0x1f   :  { %179 = vmatmul.f32.gmra.mxu0 %v57_v6 }
  0x8a   :  { %v89_v23 = vpop.f32.mrf.mxu1 }
  0x8c   :  { %v55_v20 = vpop.f32.mrf.mxu0 }
  0x8d   :  { %v90_v24 = vadd.f32 %v89_v23, %v55_v20 }
  0x90   :  { %v93_v22 = vpop.f32.mrf.mxu3 }
  0x91   :  { %v63_v21 = vpop.f32.mrf.mxu2 }
  0x92   :  { %v202_v29 = vpop.f32.mrf.mxu1  ;;  %v94_v32 = vadd.f32 %v93_v22, %v63_v21 }
  0x94   :  { %v176_v25 = vpop.f32.mrf.mxu0 }
  0x98   :  { %v146_v27 = vpop.f32.mrf.mxu3 }
  0x99   :  { %v117_v26 = vpop.f32.mrf.mxu2 }
  0x9a   :  { %v118_v28 = vadd.f32 %v117_v26, %v90_v24  ;;  %v206_v39 = vpop.f32.mrf.mxu1 }
  0x9c   :  { %v147_v30 = vadd.f32 %v146_v27, %v118_v28  ;;  %v180_v37 = vpop.f32.mrf.mxu0 }
  0x9e   :  { %v177_v31 = vadd.f32 %v176_v25, %v147_v30 }
  0xa0   :  { %v203_v33 = vadd.f32 %v202_v29, %v177_v31  ;;  %v152_v35 = vpop.f32.mrf.mxu3 }
  0xa1   :  { %v122_v34 = vpop.f32.mrf.mxu2 }
  0xa2   :  { %v123_v36 = vadd.f32 %v122_v34, %v94_v32  ;;  %223 = vrot.lane.b32.xlu2 %v203_v33, %s834_s0  ;;  %217 = vrot.lane.b32.xlu1 %v203_v33, %s835_s1  ;;  %v232_v46 = vrot.slane %v203_v33, 4 }
  0xa3   :  { %211 = vrot.lane.b32.xlu0 %v203_v33, %s836_s27 }
  0xa4   :  { %v153_v38 = vadd.f32 %v152_v35, %v123_v36 }
  0xa6   :  { %v181_v40 = vadd.f32 %v180_v37, %v153_v38 }
  0xa8   :  { %v887_v41 = vadd.f32 %v206_v39, %v181_v40 }
  0xaa   :  { %225 = vrot.lane.b32.xlu2 %v887_v41, %s834_s0  ;;  %219 = vrot.lane.b32.xlu1 %v887_v41, %s835_s1  ;;  %v288_v26 = vrot.slane %v887_v41, 4 }
  0xab   :  { %213 = vrot.lane.b32.xlu0 %v887_v41, %s836_s27 }
  0xfc   :  { %v224_v44 = vpop.permute.xlu2 %223 }
  0xfd   :  { %v242_v47 = vrot.slane %v224_v44, 4 }
 0x104   :  { %v226_v1 = vpop.permute.xlu2 %225 }
 0x105   :  { %v298_v11 = vrot.slane %v226_v1, 4 }
 0x114   :  { %v218_v48 = vpop.permute.xlu1 %217 }
 0x115   :  { %v229_v51 = vrot.slane %v218_v48, 4  ;;  %v233_v52 = vsel %vm230_vm1, %v218_v48, %v232_v46  ;;  %v212_v53 = vpop.permute.xlu0 %211 }
 0x116   :  { %v241_v54 = vperm.slane %v233_v52, %v892_v45  ;;  %v243_v55 = vsel %vm230_vm1, %v242_v47, %v212_v53  ;;  %v244_v56 = vrot.slane %v212_v53, 4 }
 0x117   :  { %v231_v57 = vsel %vm230_vm1, %v229_v51, %v203_v33  ;;  %v249_v58 = vperm.slane %v243_v55, %v892_v45 }
 0x118   :  { %v237_v59 = vperm.slane %v231_v57, %v892_v45  ;;  %v268_v60 = vrot.slane %v241_v54, 4  ;;  %v245_v62 = vsel %vm230_vm1, %v224_v44, %v244_v56 }
 0x119   :  { %v253_v63 = vperm.slane %v245_v62, %v892_v45  ;;  %v254_v0 = vrot.slane %v249_v58, 4 }
 0x11a   :  { %v256_v2 = vrot.slane %v237_v59, 4 }
 0x11b   :  { %v255_v3 = vsel %vm230_vm1, %v254_v0, %v237_v59  ;;  %v266_v4 = vrot.slane %v253_v63, 4  ;;  %v269_v6 = vsel %vm230_vm1, %v253_v63, %v268_v60 }
 0x11c   :  { %v257_v7 = vsel %vm230_vm1, %v249_v58, %v256_v2  ;;  %v913_v8 = vperm.slane %v255_v3, %v900_v61  ;;  %v220_v9 = vpop.permute.xlu1 %219  ;;  %v277_v10 = vperm.slane %v269_v6, %v900_v61 }
 0x11d   :  { %v286_v12 = vrot.slane %v220_v9, 4  ;;  %v214_v13 = vpop.permute.xlu0 %213  ;;  %v265_v14 = vperm.slane %v257_v7, %v900_v61  ;;  %v267_v20 = vsel %vm230_vm1, %v266_v4, %v241_v54  ;;  %v289_v30 = vsel %vm230_vm1, %v220_v9, %v288_v26 }
 0x11e   :  { %v343_v15 = vmul.f32 %v908_v5, %v913_v8  ;;  %v299_v17 = vsel %vm230_vm1, %v298_v11, %v214_v13  ;;  %v349_v18 = vmul.f32 %v908_v5, %v277_v10  ;;  %v300_v21 = vrot.slane %v214_v13, 4 }
 0x11f   :  { %v411_v19 = vmul.f32 %v922_v16, %v265_v14  ;;  %v287_v23 = vsel %vm230_vm1, %v286_v12, %v887_v41  ;;  %v305_v27 = vperm.slane %v299_v17, %v892_v45  ;;  %v273_v28 = vperm.slane %v267_v20, %v900_v61 }
 0x120   :  { %v360_v22 = vsel %vm359_vm2, %v343_v15, 0.0  ;;  %v378_v24 = vsel %vm359_vm2, %v349_v18, 0.0  ;;  %v284_v29 = vrot.slane %v277_v10, 4  ;;  %v293_v31 = vperm.slane %v287_v23, %v892_v45 }
 0x121   :  { %361 = vadd.xlane.f32.xlu0 %v360_v22  ;;  %v431_v25 = vsel %vm359_vm2, %v411_v19, 0.0  ;;  %379 = vadd.xlane.f32.xlu2 %v378_v24  ;;  %v301_v32 = vsel %vm230_vm1, %v226_v1, %v300_v21  ;;  %v347_v33 = vmul.f32 %v908_v5, %v273_v28  ;;  %v415_v34 = vmul.f32 %v922_v16, %v277_v10 }
 0x122   :  { %432 = vadd.xlane.f32.xlu1 %v431_v25  ;;  %v285_v35 = vsel %vm230_vm1, 0.0, %v284_v29  ;;  %v484_v36 = vsel %vm230_vm1, %v284_v29, %v273_v28  ;;  %v278_v37 = vrot.slane %v913_v8, 4  ;;  %v310_v38 = vrot.slane %v305_v27, 4 }
 0x123   :  { %v416_v39 = vmul.f32 %v922_v16, %v285_v35  ;;  %v488_v40 = vperm.slane %v484_v36, %v892_v45  ;;  %v297_v41 = vperm.slane %v289_v30, %v892_v45  ;;  %v489_v42 = vrot.slane %v285_v35, 4 }
 0x124   :  { %v312_v43 = vrot.slane %v293_v31, 4  ;;  %v309_v44 = vperm.slane %v301_v32, %v892_v45  ;;  %v372_v46 = vsel %vm359_vm2, %v347_v33, 0.0  ;;  %v282_v47 = vrot.slane %v273_v28, 4 }
 0x125   :  { %v443_v48 = vsel %vm359_vm2, %v415_v34, 0.0  ;;  %v446_v49 = vsel %vm359_vm2, %v416_v39, 0.0  ;;  %v952_v50 = vsel %vm230_vm1, 0.0, %v278_v37  ;;  %v280_v51 = vrot.slane %v265_v14, 4 }
 0x126   :  { %v311_v52 = vsel %vm230_vm1, %v310_v38, %v293_v31  ;;  %v509_v53 = vrot.slane %v488_v40, 4  ;;  %v345_v54 = vmul.f32 %v908_v5, %v265_v14  ;;  %v957_v55 = vsel %vm230_vm1, 0.0, %v282_v47 }
 0x127   :  { %v413_v56 = vmul.f32 %v922_v16, %v273_v28  ;;  %v490_v57 = vsel %vm230_vm1, %v489_v42, %v957_v55  ;;  %v963_v58 = vsel %vm230_vm1, 0.0, %v280_v51  ;;  %v473_v59 = vsel %vm230_vm1, %v280_v51, %v913_v8 }
 0x128   :  { %v344_v60 = vmul.f32 %v908_v5, %v952_v50  ;;  %v494_v62 = vperm.slane %v490_v57, %v892_v45  ;;  %v477_v63 = vperm.slane %v473_v59, %v892_v45  ;;  %v478_v0 = vrot.slane %v963_v58, 4 }
 0x129   :  { %373 = vadd.xlane.f32.xlu0 %v372_v46  ;;  %444 = vadd.xlane.f32.xlu2 %v443_v48  ;;  %v324_v1 = vrot.slane %v297_v41, 4  ;;  %v322_v2 = vrot.slane %v309_v44, 4  ;;  %v313_v3 = vsel %vm230_vm1, %v305_v27, %v312_v43  ;;  %v977_v9 = vperm.slane %v311_v52, %v900_v61 }
 0x12a   :  { %447 = vadd.xlane.f32.xlu1 %v446_v49  ;;  %v507_v4 = vrot.slane %v494_v62, 4  ;;  %v510_v6 = vsel %vm230_vm1, %v494_v62, %v509_v53  ;;  %v479_v7 = vsel %vm230_vm1, %v478_v0, %v952_v50  ;;  %v497_v12 = vrot.slane %v477_v63, 4 }
 0x12b   :  { %v518_v10 = vperm.slane %v510_v6, %v900_v61  ;;  %v483_v11 = vperm.slane %v479_v7, %v892_v45  ;;  %v366_v13 = vsel %vm359_vm2, %v345_v54, 0.0  ;;  %v437_v14 = vsel %vm359_vm2, %v413_v56, 0.0 }
 0x12c   :  { %v363_v15 = vsel %vm359_vm2, %v344_v60, 0.0  ;;  %v508_v17 = vsel %vm230_vm1, %v507_v4, %v488_v40  ;;  %v325_v23 = vsel %vm230_vm1, %v309_v44, %v324_v1  ;;  %v323_v24 = vsel %vm230_vm1, %v322_v2, %v297_v41 }
 0x12d   :  { %v514_v18 = vperm.slane %v508_v17, %v900_v61  ;;  %v523_v19 = vrot.slane %v518_v10, 4  ;;  %v495_v20 = vrot.slane %v483_v11, 4  ;;  %v498_v21 = vsel %vm230_vm1, %v483_v11, %v497_v12 }
 0x12e   :  { %v506_v22 = vperm.slane %v498_v21, %v900_v61  ;;  %v409_v25 = vmul.f32 %v922_v16, %v913_v8  ;;  %v994_v28 = vperm.slane %v323_v24, %v900_v61  ;;  %v350_v29 = vmul.f32 %v908_v5, %v285_v35 }
 0x12f   :  { %v519_v26 = vrot.slane %v514_v18, 4  ;;  %v496_v27 = vsel %vm230_vm1, %v495_v20, %v477_v63  ;;  %v348_v33 = vmul.f32 %v908_v5, %v957_v55  ;;  %v333_v8 = vperm.slane %v325_v23, %v900_v61 }
 0x130   :  { %v502_v30 = vperm.slane %v496_v27, %v900_v61  ;;  %v525_v31 = vrot.slane %v506_v22, 4  ;;  %v524_v32 = vsel %vm230_vm1, %v523_v19, %v506_v22  ;;  %v1004_v34 = vperm.slane %v313_v3, %v900_v61 }
 0x131   :  { %438 = vadd.xlane.f32.xlu0 %v437_v14  ;;  %367 = vadd.xlane.f32.xlu2 %v366_v13  ;;  %586 = vst.msk [vmem:[#allocation2 + $0x20] sm:$0xff] %vm581_vm3, %v524_v32  ;;  %v338_v36 = vrot.slane %v994_v28, 4  ;;  %v425_v40 = vsel %vm359_vm2, %v409_v25, 0.0  ;;  %v381_v41 = vsel %vm359_vm2, %v350_v29, 0.0  ;;  %v334_v43 = vrot.slane %v977_v9, 4 }
 0x132   :  { %364 = vadd.xlane.f32.xlu1 %v363_v15  ;;  %v521_v37 = vrot.slane %v502_v30, 4  ;;  %v520_v35 = vsel %vm230_vm1, %v519_v26, %v502_v30  ;;  %v526_v38 = vsel %vm230_vm1, %v518_v10, %v525_v31  ;;  %v375_v44 = vsel %vm359_vm2, %v348_v33, 0.0 }
 0x133   :  { %582 = vst.msk [vmem:[#allocation2] sm:$0xff] %vm581_vm3, %v520_v35  ;;  %v1011_v39 = vsel %vm230_vm1, 0.0, %v338_v36  ;;  %v336_v46 = vrot.slane %v1004_v34, 4  ;;  %v423_v48 = vmul.f32 %v922_v16, %v333_v8  ;;  %v346_v49 = vmul.f32 %v908_v5, %v963_v58 }
 0x134   :  { %v522_v42 = vsel %vm230_vm1, %v514_v18, %v521_v37  ;;  %588 = vst.msk [vmem:[#allocation2 + $0x30] sm:$0xff] %vm581_vm3, %v526_v38  ;;  %v422_v47 = vmul.f32 %v922_v16, %v1011_v39  ;;  %v410_v51 = vmul.f32 %v922_v16, %v952_v50  ;;  %v335_v52 = vsel %vm230_vm1, 0.0, %v334_v43 }
 0x135   :  { %584 = vst.msk [vmem:[#allocation2 + $0x10] sm:$0xff] %vm581_vm3, %v522_v42  ;;  %v340_v53 = vrot.slane %v333_v8, 4  ;;  %v352_v54 = vmul.f32 %v908_v5, %v335_v52  ;;  %v1031_v56 = vsel %vm230_vm1, 0.0, %v336_v46  ;;  %v527_v57 = vsel %vm230_vm1, %v336_v46, %v977_v9 }
 0x136   :  { %v418_v59 = vmul.f32 %v922_v16, %v335_v52  ;;  %v357_v60 = vmul.f32 %v908_v5, %v333_v8  ;;  %v531_v62 = vperm.slane %v527_v57, %v892_v45  ;;  %v532_v63 = vrot.slane %v1031_v56, 4 }
 0x137   :  { %v354_v50 = vmul.f32 %v908_v5, %v1031_v56  ;;  %v1042_v0 = vsel %vm359_vm2, %v352_v54, 0.0  ;;  %v1048_v2 = vsel %vm359_vm2, %v422_v47, 0.0  ;;  %v1051_v3 = vsel %vm359_vm2, %v423_v48, 0.0 }
 0x138   :  { %v1045_v1 = vsel %vm359_vm2, %v418_v59, 0.0  ;;  %v533_v4 = vsel %vm230_vm1, %v532_v63, %v335_v52  ;;  %v551_v6 = vrot.slane %v531_v62, 4  ;;  %v428_v10 = vsel %vm359_vm2, %v410_v51, 0.0 }
 0x139   :  { %382 = vadd.xlane.f32.xlu0 %v381_v41  ;;  %426 = vadd.xlane.f32.xlu2 %v425_v40  ;;  %v1055_v7 = vsel %vm359_vm2, %v354_v50, 0.0  ;;  %v537_v11 = vperm.slane %v533_v4, %v892_v45  ;;  %v341_v12 = vsel %vm230_vm1, 0.0, %v340_v53  ;;  %v538_v13 = vsel %vm230_vm1, %v340_v53, %v994_v28 }
 0x13a   :  { %376 = vadd.xlane.f32.xlu1 %v375_v44  ;;  %v424_v14 = vmul.f32 %v922_v16, %v341_v12  ;;  %v542_v15 = vperm.slane %v538_v13, %v892_v45  ;;  %v543_v17 = vrot.slane %v341_v12, 4  ;;  %v358_v18 = vmul.f32 %v908_v5, %v341_v12 }
 0x13b   :  { %v369_v19 = vsel %vm359_vm2, %v346_v49, 0.0  ;;  %v402_v20 = vsel %vm359_vm2, %v357_v60, 0.0  ;;  %v549_v21 = vrot.slane %v537_v11, 4  ;;  %v552_v22 = vsel %vm230_vm1, %v537_v11, %v551_v6 }
 0x13c   :  { %v560_v23 = vperm.slane %v552_v22, %v900_v61  ;;  %v470_v24 = vsel %vm359_vm2, %v424_v14, 0.0  ;;  %v544_v25 = vsel %vm230_vm1, %v543_v17, %v1011_v39  ;;  %v563_v26 = vrot.slane %v542_v15, 4 }
 0x13d   :  { %v550_v27 = vsel %vm230_vm1, %v549_v21, %v531_v62  ;;  %v548_v29 = vperm.slane %v544_v25, %v892_v45  ;;  %v405_v30 = vsel %vm359_vm2, %v358_v18, 0.0  ;;  %v414_v31 = vmul.f32 %v922_v16, %v957_v55 }
 0x13e   :  { %v556_v32 = vperm.slane %v550_v27, %v900_v61  ;;  %v579_v33 = vrot.slane %v560_v23, 4  ;;  %v412_v8 = vmul.f32 %v922_v16, %v963_v58  ;;  %v351_v36 = vmul.f32 %v908_v5, %v977_v9 }
 0x13f   :  { %v561_v37 = vrot.slane %v548_v29, 4  ;;  %v564_v35 = vsel %vm230_vm1, %v548_v29, %v563_v26  ;;  %v440_v41 = vsel %vm359_vm2, %v414_v31, 0.0  ;;  %v355_v51 = vmul.f32 %v908_v5, %v994_v28 }
 0x140   :  { %v575_v38 = vrot.slane %v556_v32, 4  ;;  %v572_v45 = vperm.slane %v564_v35, %v900_v61  ;;  %v434_v58 = vsel %vm359_vm2, %v412_v8, 0.0  ;;  %v384_v44 = vsel %vm359_vm2, %v351_v36, 0.0 }
 0x141   :  { %429 = vadd.xlane.f32.xlu0 %v428_v10  ;;  %370 = vadd.xlane.f32.xlu2 %v369_v19  ;;  %v562_v40 = vsel %vm230_vm1, %v561_v37, %v542_v15  ;;  %v417_v52 = vmul.f32 %v922_v16, %v977_v9  ;;  %v396_v54 = vsel %vm359_vm2, %v355_v51, 0.0  ;;  %v356_v59 = vmul.f32 %v908_v5, %v1011_v39 }
 0x142   :  { %403 = vadd.xlane.f32.xlu1 %v402_v20  ;;  %v568_v55 = vperm.slane %v562_v40, %v900_v61  ;;  %v577_v42 = vrot.slane %v572_v45, 4  ;;  %v580_v43 = vsel %vm230_vm1, %v572_v45, %v579_v33  ;;  %v353_v61 = vmul.f32 %v908_v5, %v1004_v34 }
 0x143   :  { %589 = vst.msk [vmem:[#allocation2 + $0x38] sm:$0xff] %vm581_vm3, %v580_v43  ;;  %v449_v57 = vsel %vm359_vm2, %v417_v52, 0.0  ;;  %v421_v60 = vmul.f32 %v922_v16, %v994_v28  ;;  %v419_v9 = vmul.f32 %v922_v16, %v1004_v34  ;;  %v399_v62 = vsel %vm359_vm2, %v356_v59, 0.0 }
 0x144   :  { %v573_v46 = vrot.slane %v568_v55, 4  ;;  %v576_v47 = vsel %vm230_vm1, %v568_v55, %v575_v38  ;;  %v578_v48 = vsel %vm230_vm1, %v577_v42, %v560_v23  ;;  %v390_v53 = vsel %vm359_vm2, %v353_v61, 0.0 }
 0x145   :  { %585 = vst.msk [vmem:[#allocation2 + $0x18] sm:$0xff] %vm581_vm3, %v576_v47  ;;  %v461_v63 = vsel %vm359_vm2, %v421_v60, 0.0  ;;  %v455_v50 = vsel %vm359_vm2, %v419_v9, 0.0  ;;  %v420_v4 = vmul.f32 %v922_v16, %v1031_v56 }
 0x146   :  { %v574_v49 = vsel %vm230_vm1, %v573_v46, %v556_v32  ;;  %587 = vst.msk [vmem:[#allocation2 + $0x28] sm:$0xff] %vm581_vm3, %v578_v48 }
 0x147   :  { %583 = vst.msk [vmem:[#allocation2 + $0x8] sm:$0xff] %vm581_vm3, %v574_v49  ;;  %v458_v5 = vsel %vm359_vm2, %v420_v4, 0.0 }
 0x148   :  { %744 = dma.vmem_to_hbm [thread:$0]  %s737_s14, 1024, %s739_s12, [#allocation3], %s840_s15, %s840_s15, %s841_s16  }
 0x149   :  { %441 = vadd.xlane.f32.xlu0 %v440_v41  ;;  %435 = vadd.xlane.f32.xlu2 %v434_v58 }
 0x14a   :  { %385 = vadd.xlane.f32.xlu1 %v384_v44 }
 0x151   :  { %391 = vadd.xlane.f32.xlu0 %v390_v53  ;;  %397 = vadd.xlane.f32.xlu2 %v396_v54 }
 0x152   :  { %450 = vadd.xlane.f32.xlu1 %v449_v57 }
 0x159   :  { %400 = vadd.xlane.f32.xlu0 %v399_v62  ;;  %462 = vadd.xlane.f32.xlu2 %v461_v63 }
 0x15a   :  { %456 = vadd.xlane.f32.xlu1 %v455_v50 }
 0x161   :  { %459 = vadd.xlane.f32.xlu0 %v458_v5  ;;  %388 = vadd.xlane.f32.xlu2 %v1042_v0  ;;  %v606_v0 = vlaneseq }
 0x162   :  { %394 = vadd.xlane.f32.xlu1 %v1055_v7 }
 0x169   :  { %465 = vadd.xlane.f32.xlu0 %v1048_v2  ;;  %453 = vadd.xlane.f32.xlu2 %v1045_v1  ;;  %v1123_v2 = vand.u32 127, %v606_v0 }
 0x16a   :  { %468 = vadd.xlane.f32.xlu1 %v1051_v3 }
 0x171   :  { %406 = vadd.xlane.f32.xlu0 %v405_v30  ;;  %471 = vadd.xlane.f32.xlu2 %v470_v24 }
 0x194   :  { %v362_v28 = vpop.xlane.xlu0 %361  ;;  %v380_v34 = vpop.xlane.xlu2 %379 }
 0x195   :  { %v433_v39 = vpop.xlane.xlu1 %432  ;;  %v608_v3 = vperm.slane %v362_v28, %v1123_v2  ;;  %v614_v27 = vperm.slane %v380_v34, %v1123_v2 }
 0x196   :  { %v668_v35 = vperm.slane %v433_v39, %v1123_v2 }
 0x19c   :  { %v374_v6 = vpop.xlane.xlu0 %373  ;;  %v445_v16 = vpop.xlane.xlu2 %444 }
 0x19d   :  { %v448_v56 = vpop.xlane.xlu1 %447  ;;  %v612_v22 = vperm.slane %v374_v6, %v1123_v2  ;;  %v672_v58 = vperm.slane %v445_v16, %v1123_v2 }
 0x19e   :  { %v673_v46 = vperm.slane %v448_v56, %v1123_v2 }
 0x1a4   :  { %v439_v10 = vpop.xlane.xlu0 %438  ;;  %v368_v11 = vpop.xlane.xlu2 %367 }
 0x1a5   :  { %v365_v12 = vpop.xlane.xlu1 %364  ;;  %v610_v18 = vperm.slane %v368_v11, %v1123_v2  ;;  %v670_v41 = vperm.slane %v439_v10, %v1123_v2 }
 0x1a6   :  { %v609_v1 = vperm.slane %v365_v12, %v1123_v2 }
 0x1a8   :  { %v625_v15 = vsel %vm624_vm4, %v609_v1, %v608_v3 }
 0x1a9   :  { %v627_v23 = vsel %vm626_vm5, %v610_v18, %v625_v15 }
 0x1ac   :  { %v383_v13 = vpop.xlane.xlu0 %382  ;;  %v427_v7 = vpop.xlane.xlu2 %426 }
 0x1ad   :  { %v377_v14 = vpop.xlane.xlu1 %376  ;;  %v666_v30 = vperm.slane %v427_v7, %v1123_v2  ;;  %v615_v31 = vperm.slane %v383_v13, %v1123_v2 }
 0x1ae   :  { %v613_v24 = vperm.slane %v377_v14, %v1123_v2 }
 0x1b4   :  { %v430_v17 = vpop.xlane.xlu0 %429  ;;  %v371_v19 = vpop.xlane.xlu2 %370 }
 0x1b5   :  { %v1129_v20 = vpop.xlane.xlu1 %403  ;;  %v611_v21 = vperm.slane %v371_v19, %v1123_v2  ;;  %v667_v26 = vperm.slane %v430_v17, %v1123_v2 }
 0x1b7   :  { %v629_v25 = vsel %vm628_vm6, %v611_v21, %v627_v23  ;;  %v682_v8 = vsel %vm624_vm4, %v667_v26, %v666_v30  ;;  %v622_v21 = vperm.slane %v1129_v20, %v1123_v2 }
 0x1b8   :  { %v631_v29 = vsel %vm630_vm7, %v612_v22, %v629_v25  ;;  %v683_v55 = vsel %vm626_vm5, %v668_v35, %v682_v8 }
 0x1b9   :  { %v633_v32 = vsel %vm632_vm8, %v613_v24, %v631_v29 }
 0x1ba   :  { %v635_v33 = vsel %vm634_vm9, %v614_v27, %v633_v32 }
 0x1bb   :  { %v637_v37 = vsel %vm636_vm10, %v615_v31, %v635_v33 }
 0x1bc   :  { %v442_v36 = vpop.xlane.xlu0 %441  ;;  %v436_v38 = vpop.xlane.xlu2 %435  ;;  %648 = vst.msk [vmem:[%s1207_s5] sm:$0xff] %vm647_vm11, %v637_v37 }
 0x1bd   :  { %v386_v45 = vpop.xlane.xlu1 %385  ;;  %v669_v40 = vperm.slane %v436_v38, %v1123_v2  ;;  %v671_v43 = vperm.slane %v442_v36, %v1123_v2 }
 0x1be   :  { %v616_v9 = vperm.slane %v386_v45, %v1123_v2 }
 0x1bf   :  { %v684_v42 = vsel %vm628_vm6, %v669_v40, %v683_v55 }
 0x1c0   :  { %v685_v44 = vsel %vm630_vm7, %v670_v41, %v684_v42 }
 0x1c1   :  { %v686_v47 = vsel %vm632_vm8, %v671_v43, %v685_v44 }
 0x1c2   :  { %v687_v48 = vsel %vm634_vm9, %v672_v58, %v686_v47 }
 0x1c3   :  { %v688_v49 = vsel %vm636_vm10, %v673_v46, %v687_v48 }
 0x1c4   :  { %v392_v61 = vpop.xlane.xlu0 %391  ;;  %v398_v51 = vpop.xlane.xlu2 %397  ;;  %698 = vxpose.xlu1.b32.start [1/2] (short) (narrow) %v688_v49, 8 }
 0x1c5   :  { %v451_v52 = vpop.xlane.xlu1 %450  ;;  %v618_v50 = vperm.slane %v392_v61, %v1123_v2  ;;  %v620_v16 = vperm.slane %v398_v51, %v1123_v2 }
 0x1c6   :  { %v674_v56 = vperm.slane %v451_v52, %v1123_v2 }
 0x1cc   :  { %v401_v53 = vpop.xlane.xlu0 %400  ;;  %v463_v54 = vpop.xlane.xlu2 %462 }
 0x1cd   :  { %v457_v57 = vpop.xlane.xlu1 %456  ;;  %v678_v7 = vperm.slane %v463_v54, %v1123_v2  ;;  %v621_v14 = vperm.slane %v401_v53, %v1123_v2 }
 0x1ce   :  { %v676_v11 = vperm.slane %v457_v57, %v1123_v2 }
 0x1d4   :  { %v460_v59 = vpop.xlane.xlu0 %459  ;;  %v389_v60 = vpop.xlane.xlu2 %388 }
 0x1d5   :  { %v617_v62 = vperm.slane %v389_v60, %v1123_v2  ;;  %v395_v63 = vpop.xlane.xlu1 %394  ;;  %v677_v12 = vperm.slane %v460_v59, %v1123_v2 }
 0x1d6   :  { %v619_v5 = vperm.slane %v395_v63, %v1123_v2 }
 0x1d7   :  { %v638_v4 = vsel %vm624_vm4, %v617_v62, %v616_v9 }
 0x1d8   :  { %v639_v28 = vsel %vm626_vm5, %v618_v50, %v638_v4 }
 0x1d9   :  { %v640_v39 = vsel %vm628_vm6, %v619_v5, %v639_v28 }
 0x1da   :  { %v641_v0 = vsel %vm630_vm7, %v620_v16, %v640_v39 }
 0x1db   :  { %v642_v19 = vsel %vm632_vm8, %v621_v14, %v641_v0 }
 0x1dc   :  { %v466_v34 = vpop.xlane.xlu0 %465  ;;  %v454_v6 = vpop.xlane.xlu2 %453  ;;  %v643_v29 = vsel %vm634_vm9, %v622_v21, %v642_v19 }
 0x1dd   :  { %v675_v10 = vperm.slane %v454_v6, %v1123_v2  ;;  %v679_v3 = vperm.slane %v466_v34, %v1123_v2  ;;  %v469_v17 = vpop.xlane.xlu1 %468 }
 0x1de   :  { %v680_v24 = vperm.slane %v469_v17, %v1123_v2 }
 0x1df   :  { %v689_v13 = vsel %vm624_vm4, %v675_v10, %v674_v56 }
 0x1e0   :  { %v690_v1 = vsel %vm626_vm5, %v676_v11, %v689_v13 }
 0x1e1   :  { %v691_v15 = vsel %vm628_vm6, %v677_v12, %v690_v1 }
 0x1e2   :  { %v692_v18 = vsel %vm630_vm7, %v678_v7, %v691_v15 }
 0x1e3   :  { %v693_v22 = vsel %vm632_vm8, %v679_v3, %v692_v18 }
 0x1e4   :  { %v407_v23 = vpop.xlane.xlu0 %406  ;;  %v472_v25 = vpop.xlane.xlu2 %471  ;;  %v694_v31 = vsel %vm634_vm9, %v680_v24, %v693_v22 }
 0x1e5   :  { %v623_v26 = vperm.slane %v407_v23, %v1123_v2  ;;  %v681_v27 = vperm.slane %v472_v25, %v1123_v2 }
 0x1e7   :  { %v644_v30 = vsel %vm636_vm10, %v623_v26, %v643_v29  ;;  %v695_v20 = vsel %vm636_vm10, %v681_v27, %v694_v31 }
 0x1e8   :  { %649 = vst.msk [vmem:[%s1207_s5 + $0x8] sm:$0xff] %vm647_vm11, %v644_v30  ;;  %699 = vxpose.xlu1.b32.end [2/2] (short) (narrow) %v695_v20, 8  ;;  %s754_s5 = sshll.u32 %s1208_s6, 4  ;;  %s755_s5 = int_to_ptr.hbm [resolvable:$true] %s754_s5 }
 0x284   :  { %v714_v2 = vpop.trf.xlu1 }
 0x285   :  { %731 = vst.msk [vmem:[#allocation4] sm:$0xf] %vm730_vm12, %v714_v2 }
 0x286   :  { %757 = dma.vmem_to_hbm [thread:$0]  %s753_s18, 64, %s755_s5, [#allocation5]  }
 0x287   :  { %830 = dma.done.wait [#allocation3], 1024  }
 0x288   :  { %831 = vsyncadd [#allocation3], 4294966272 }
 0x289   :  { %832 = dma.done.wait [#allocation5], 64  }
 0x28a   :  { %833 = vsyncadd [#allocation5], 4294967232 }
 0x28b   :  { %768 = vsyncpa [#allocation3], 1 }
 0x28c   :  { %769 = vsyncpa [#allocation5], 1 }

</bundles_post_ra>
